<compile_context>
chip_gen: v7x
topology: tpu7x:2x2x1
jax: 0.10.0
libtpu: 0.0.40
codegen_flags: <defaults>
</compile_context>

<pallas_src>
import functools

import jax
import jax.numpy as jnp
from jax.experimental import pallas as pl
from jax.experimental.pallas import tpu as pltpu


def _round_up(x, m):
    return ((x + m - 1) // m) * m


def _relpos_linear_kernel(x_ref, w_ref, rel_ref, o_ref, *,
                          tm, tn, nb, rel_mblocks, compute_dtype):
    # x_ref:   (TM, K_pad)      f32 (cast to compute dtype in-kernel, VPU-free)
    # w_ref:   (K_pad, h_pad)   compute dtype, VMEM-resident (DMA'd once)
    # rel_ref: (L_pad, h_pad)   f32, relpos rows with bias folded in, resident
    # o_ref:   (TM, TN)
    m = pl.program_id(0)
    n = pl.program_id(1)

    col = 0 if nb == 1 else pl.multiple_of(n * tn, tn)
    row = 0 if rel_mblocks == 1 else pl.multiple_of((m % rel_mblocks) * tm, tm)

    x = x_ref[...].astype(compute_dtype)
    w = w_ref[:, pl.ds(col, tn)]
    acc = jnp.dot(x, w, preferred_element_type=jnp.float32)

    rel = rel_ref[pl.ds(row, tm), pl.ds(col, tn)]
    o_ref[...] = (acc + rel).astype(o_ref.dtype)


def relpos_linear(x, weight, bias, rel_table, max_dist, *,
                  compute_dtype=jnp.bfloat16, tm=512, out_dtype=None):
    """x: (B, L, in_dim); weight: (in_dim, h); bias: (h,); rel_table: (2*md+1, h)."""
    B, L, K = x.shape
    h = weight.shape[1]
    out_dtype = x.dtype if out_dtype is None else out_dtype

    # ---- tiling choices (lane-dense, MXU-friendly, M-outer grid) ----
    h_pad = _round_up(h, 128)
    K_pad = _round_up(K, 128)
    TN = 256 if (h_pad % 256 == 0) else 128
    if L >= tm:
        TM = tm
        L_pad = _round_up(L, TM)
    else:
        TM = _round_up(L, 16)          # bf16 packs 16 rows / sublane group
        L_pad = TM
    assert L_pad % TM == 0             # protects the m % rel_mblocks indexing
    M_pad = B * L_pad
    MB = M_pad // TM
    NB = h_pad // TN
    rel_mblocks = L_pad // TM

    # ---- plain-JAX glue: static relpos gather, fold bias, pad, flatten ----
    offs = jnp.clip(jnp.arange(L), -max_dist, max_dist) + max_dist
    rel_plus = (rel_table[offs] + bias[None, :]).astype(jnp.float32)         # (L, h)
    rel_plus = jnp.pad(rel_plus, ((0, L_pad - L), (0, h_pad - h)))           # (L_pad, h_pad)

    # x stays in its original dtype; cast happens inside the kernel.
    x_p = jnp.pad(x, ((0, 0), (0, L_pad - L), (0, K_pad - K))).reshape(M_pad, K_pad)
    w_p = jnp.pad(weight, ((0, K_pad - K), (0, h_pad - h))).astype(compute_dtype)

    # ---- VMEM budget from the actual footprint (double-buffered) ----
    bytes_x = 2 * TM * K_pad * x_p.dtype.itemsize
    bytes_w = 2 * K_pad * h_pad * jnp.dtype(compute_dtype).itemsize
    bytes_rel = 2 * L_pad * h_pad * 4
    bytes_o = 2 * TM * TN * jnp.dtype(out_dtype).itemsize
    vmem_bytes = bytes_x + bytes_w + bytes_rel + bytes_o
    vmem_limit = min(max(2 * vmem_bytes + (2 << 20), 8 << 20), 56 << 20)

    kernel = functools.partial(
        _relpos_linear_kernel,
        tm=TM, tn=TN, nb=NB, rel_mblocks=rel_mblocks, compute_dtype=compute_dtype)

    out_pad = pl.pallas_call(
        kernel,
        out_shape=jax.ShapeDtypeStruct((M_pad, h_pad), out_dtype),
        grid_spec=pltpu.PrefetchScalarGridSpec(
            num_scalar_prefetch=0,
            grid=(MB, NB),                                  # M outer, N inner
            in_specs=[
                # x block index depends only on m (outer) -> streamed once.
                pl.BlockSpec((TM, K_pad), lambda m, n: (m, 0)),
                # weight: full-array resident, DMA'd once.
                pl.BlockSpec((K_pad, h_pad), lambda m, n: (0, 0)),
                # relpos(+bias) slab: full-array resident, DMA'd once.
                pl.BlockSpec((L_pad, h_pad), lambda m, n: (0, 0)),
            ],
            out_specs=pl.BlockSpec((TM, TN), lambda m, n: (m, n)),
        ),
        compiler_params=pltpu.CompilerParams(
            dimension_semantics=("parallel", "parallel"),
            vmem_limit_bytes=vmem_limit,
        ),
    )(x_p, w_p, rel_plus)

    return out_pad.reshape(B, L_pad, h_pad)[:, :L, :h]


def relpos_linear_ref(x, weight, bias, rel_table, max_dist,
                      compute_dtype=jnp.bfloat16):
    """Pure-JAX reference (same compute-dtype matmul operands, f32 accumulation)."""
    z = jnp.einsum("bld,dh->blh",
                   x.astype(compute_dtype), weight.astype(compute_dtype),
                   preferred_element_type=jnp.float32) + bias
    L = x.shape[1]
    offs = jnp.clip(jnp.arange(L), -max_dist, max_dist) + max_dist
    return (z + rel_table[offs][None]).astype(x.dtype)


if __name__ == "__main__":
    key = jax.random.PRNGKey(0)

    configs = [
        # (B, L, in_dim, h, max_dist)
        (2, 8, 32, 32, 4),        # tiny: padding paths, NB=1, rel_mblocks=1
        (2, 512, 64, 192, 16),    # TN=256, MB=2, resident weight+rel
        (1, 1024, 64, 384, 8),    # NB=3 (dynamic col slice), rel_mblocks=2 (dynamic row slice)
    ]

    for (B, L, in_dim, h, max_dist) in configs:
        kx, kw, kb, kr, key = jax.random.split(key, 5)
        x = jax.random.normal(kx, (B, L, in_dim), dtype=jnp.float32)
        # nn.Linear(in_dim, h): weight stored transposed as (in_dim, h), bias (h,)
        weight = jax.random.normal(kw, (in_dim, h), dtype=jnp.float32) * 0.1
        bias = jax.random.normal(kb, (h,), dtype=jnp.float32) * 0.1
        # nn.Embedding(2*max_dist+1, h)
        rel_table = jax.random.normal(kr, (2 * max_dist + 1, h), dtype=jnp.float32) * 0.1

        out = jax.block_until_ready(relpos_linear(x, weight, bias, rel_table, max_dist))
        ref = relpos_linear_ref(x, weight, bias, rel_table, max_dist)

        assert out.shape == (B, L, h), out.shape
        max_err = float(jnp.max(jnp.abs(out - ref)))
        assert jnp.allclose(out, ref, atol=1e-4, rtol=1e-4), max_err

    print("KERNEL_OK")
</pallas_src>

<mosaic_0001>
module attributes {stable_mosaic.version = 11 : i64} {
  func.func @_relpos_linear_kernel(%arg0: i32, %arg1: i32, %arg2: memref<16x128xf32, #tpu.memory_space<vmem>>, %arg3: memref<128x128xbf16, #tpu.memory_space<vmem>>, %arg4: memref<16x128xf32, #tpu.memory_space<vmem>>, %arg5: memref<16x128xf32, #tpu.memory_space<vmem>>) attributes {dimension_semantics = [#tpu.dimension_semantics<parallel>, #tpu.dimension_semantics<parallel>], iteration_bounds = array<i64: 2, 1>, scalar_prefetch = 0 : i64, scratch_operands = 0 : i64, tpu.core_type = #tpu.core_type<tc>, window_params = [{transform_indices = @transform_0, window_bounds = array<i64: 16, 128>}, {pipeline_mode = #tpu.pipeline_mode<synchronous>, transform_indices = @transform_1, window_bounds = array<i64: 128, 128>}, {pipeline_mode = #tpu.pipeline_mode<synchronous>, transform_indices = @transform_2, window_bounds = array<i64: 16, 128>}, {transform_indices = @transform_3, window_bounds = array<i64: 16, 128>}]} {
    %c0 = arith.constant 0 : index
    %c0_0 = arith.constant 0 : index
    %0 = vector.load %arg2[%c0, %c0_0] : memref<16x128xf32, #tpu.memory_space<vmem>>, vector<16x128xf32>
    %1 = arith.truncf %0 : vector<16x128xf32> to vector<16x128xbf16>
    %c0_1 = arith.constant 0 : index
    %c0_2 = arith.constant 0 : index
    %2 = vector.load %arg3[%c0_1, %c0_2] : memref<128x128xbf16, #tpu.memory_space<vmem>>, vector<128x128xbf16>
    %cst = arith.constant dense<0.000000e+00> : vector<16x128xf32>
    %3 = tpu.matmul %1, %2, %cst {dimension_numbers = #tpu.dot_dimension_numbers<[1], [0], [0], [1], [0, 0, 1, 1], [], []>} : vector<16x128xbf16>, vector<128x128xbf16>, vector<16x128xf32> -> vector<16x128xf32>
    %c0_3 = arith.constant 0 : index
    %c0_4 = arith.constant 0 : index
    %4 = vector.load %arg4[%c0_3, %c0_4] : memref<16x128xf32, #tpu.memory_space<vmem>>, vector<16x128xf32>
    %5 = arith.addf %3, %4 : vector<16x128xf32>
    %c0_5 = arith.constant 0 : index
    %c0_6 = arith.constant 0 : index
    %6 = vector.load %arg5[%c0_5, %c0_6] : memref<16x128xf32, #tpu.memory_space<vmem>>, vector<16x128xf32>
    tpu.vector_store %arg5[%c0_5, %c0_6], %5 {strides = array<i32>} : memref<16x128xf32, #tpu.memory_space<vmem>>, vector<16x128xf32>,
    return
  }
  func.func @transform_0(%arg0: i32, %arg1: i32) -> (i32, i32) {
    %c0_i32 = arith.constant 0 : i32
    %c0_i32_0 = arith.constant 0 : i32
    return %arg0, %c0_i32 : i32, i32
  }
  func.func @transform_1(%arg0: i32, %arg1: i32) -> (i32, i32) {
    %c0_i32 = arith.constant 0 : i32
    %c0_i32_0 = arith.constant 0 : i32
    %c0_i32_1 = arith.constant 0 : i32
    return %c0_i32, %c0_i32_0 : i32, i32
  }
  func.func @transform_2(%arg0: i32, %arg1: i32) -> (i32, i32) {
    %c0_i32 = arith.constant 0 : i32
    %c0_i32_0 = arith.constant 0 : i32
    %c0_i32_1 = arith.constant 0 : i32
    return %c0_i32, %c0_i32_0 : i32, i32
  }
  func.func @transform_3(%arg0: i32, %arg1: i32) -> (i32, i32) {
    %c0_i32 = arith.constant 0 : i32
    return %arg0, %arg1 : i32, i32
  }
}

</mosaic_0001>

<bundles_post_ra>
// kernel: tpu_custom_call.1
= control target key start
LH: loop header
LB: loop body
LE: loop exit
PB: predicated region body
PF: predicated region fallthrough
CT: control target
= control target key end

     0   :  { %8 = vsyncpa [#allocation3], 0  ;;  %s1096_s0 = inlined_call_operand.hbm [shape: f32[32,128], index: 0, kind: input, shape index: {}]   ;;  %s1097_s1 = inlined_call_operand.hbm [shape: bf16[128,128], index: 1, kind: input, shape index: {}]   ;;  %s1098_s2 = inlined_call_operand.hbm [shape: f32[16,128], index: 2, kind: input, shape index: {}]   ;;  %s1099_s3 = inlined_call_operand.hbm [shape: f32[32,128], index: 3, kind: output, shape index: {}]  }
   0x1   :  { %10 = vsyncpa [#allocation3 + $0x1], 0 }
   0x2   :  { %11 = vsyncpa [#allocation6], 0 }
   0x3   :  { %12 = vsyncpa [#allocation4], 0 }
   0x4   :  { %14 = vsyncpa [#allocation4 + $0x1], 0  ;;  %s827_s12 = smov 0   ;;  %s829_s13 = smov 0  }
   0x5   :  { %s831_s14 = smov 0   ;;  %s833_s15 = smov 0  }
   0x6   :  { %s835_s16 = smov 0   ;;  %s837_s17 = smov 0  }
   0x7 LB: > { %s464_s18 = sadd.s32 4294967295, %s793_s17   ;;  %s465_s19 = sadd.s32 4294967294, %s793_s17   ;;  %s793_s17 = sphi %s837_s17, %s20_s17   ;;  %s789_s16 = sphi %s835_s16, %s1121_s16   ;;  %s785_s15 = sphi %s833_s15, %s1120_s15   ;;  %s781_s14 = sphi %s831_s14, %s1119_s14   ;;  %s777_s13 = sphi %s829_s13, %s1118_s13   ;;  %s773_s12 = sphi %s827_s12, %s1117_s12  }
   0x8   : > { %p52_p0 = scmp.ne.s32.totalorder %s777_s13, %s773_s12  ;;  %p861_p1 = scmp.eq.s32.totalorder %s464_s18, 0 }
   0x9   : > { %p865_p2 = scmp.eq.s32.totalorder %s464_s18, 1  ;;  %p126_p3 = scmp.eq.s32.totalorder %s465_s19, 1 }
   0xa   : > { %s1104_s20 = scalar_select %p861_p1, 1, 0 }
   0xb   : > { %p871_p4 = por %p861_p1, %p52_p0  ;;  %p466_p5 = scmp.ge.s32.totalorder %s793_s17, 1 }
   0xc   : > { %p876_p6 = por %p126_p3, %p52_p0  ;;  %p133_p7 = scmp.lt.s32.totalorder %s793_s17, 3 }
   0xd   : > { %s1106_s22 = scalar_select %p871_p4, 1, 0 }
   0xe   : > { %s1107_s23 = scalar_select %p876_p6, 1, 0 }
   0xf   : > { %p881_p8 = pnand %p466_p5, %p133_p7  ;;  %s795_s25 = smov [#allocation5]  }
  0x10   : > { %s145_s26 = sshll.u32 %s795_s25, 4  ;;  %s796_s28 = smov [#allocation7]   ;;  %s885_s26 = int_to_ptr.vmem [resolvable:$true] %s145_s26 }
  0x11   : > { %p534_p9 = pneg %p881_p8  ;;  %s158_s29 = sshll.u32 %s796_s28, 4  ;;  %s896_s29 = int_to_ptr.vmem [resolvable:$true] %s158_s29 }
  0x12   : > { %s621_s5 = scalar_lea.hbm %s1097_s1, 1024 }
  0x13   : > { %p892_p11 = pnand %p534_p9, %p861_p1  ;;  %p622_p12 = scmp.ne.s32.totalorder %s1097_s1, %s621_s5 }
  0x14   : > { %p628_p5 = scmp.lt.u32.totalorder %s621_s5, %s1097_s1 }
  0x15   : > { %p623_p13 = pneg %p892_p11 }
  0x17   : > { %p624_p0 = pnand %p623_p13, %p622_p12 }
  0x19   : > { %p625_p3 = pneg %p624_p0 }
  0x1b   : > { %p630_p7 = pnand %p628_p5, %p625_p3 }
  0x1d   : > { %633 = shalt.err (!%p630_p7)
}
  0x1e   : > { %s634_s10 = scalar_lea.vmem %s885_s26, 1024  ;;  %p642_p1 = scmp.lt.s32.totalorder %s885_s26, %s885_s26 }
  0x1f   : > { %p635_p9 = scmp.ne.s32.totalorder %s885_s26, %s634_s10  ;;  %p643_p12 = scmp.lt.s32.totalorder %s634_s10, %s634_s10 }
  0x21   : > { %p637_p10 = pnand %p635_p9, %p623_p13  ;;  %p644_p0 = por %p643_p12, %p642_p1 }
  0x23   : > { %p638_p6 = pneg %p637_p10 }
  0x25   : > { %p645_p4 = pnand %p644_p0, %p638_p6 }
  0x27   : > { %648 = shalt.err (!%p645_p4)
}
  0x28   : > { %s797_s11 = smov 64   ;;  %s798_s18 = smov 4  }
  0x29   : > { %537 = dma.hbm_to_vmem [thread:$0]  (!%p892_p11), %s1097_s1, 1024, %s885_s26, [#allocation6], %s797_s11, %s797_s11, %s798_s18  }
  0x2a   : > { %s649_s4 = scalar_lea.hbm %s1098_s2, 256 }
  0x2b   : > { %p650_p1 = scmp.ne.s32.totalorder %s1098_s2, %s649_s4  ;;  %p656_p10 = scmp.lt.u32.totalorder %s649_s4, %s1098_s2 }
  0x2d   : > { %p652_p4 = pnand %p650_p1, %p623_p13 }
  0x2f   : > { %p653_p6 = pneg %p652_p4 }
  0x31   : > { %p658_p3 = pnand %p656_p10, %p653_p6 }
  0x33   : > { %661 = shalt.err (!%p658_p3)
}
  0x34   : > { %s662_s26 = scalar_lea.vmem %s896_s29, 256  ;;  %p670_p12 = scmp.lt.s32.totalorder %s896_s29, %s896_s29 }
  0x35   : > { %p663_p5 = scmp.ne.s32.totalorder %s896_s29, %s662_s26  ;;  %p671_p0 = scmp.lt.s32.totalorder %s662_s26, %s662_s26 }
  0x37   : > { %p665_p7 = pnand %p663_p5, %p623_p13  ;;  %p672_p1 = por %p671_p0, %p670_p12 }
  0x39   : > { %p666_p9 = pneg %p665_p7 }
  0x3b   : > { %p673_p4 = pnand %p672_p1, %p666_p9 }
  0x3d   : > { %676 = shalt.err (!%p673_p4)
}
  0x3e   : > { %s799_s9 = smov 128   ;;  %s800_s10 = smov 8  }
  0x3f   : > { %540 = dma.hbm_to_vmem [thread:$0]  (!%p892_p11), %s1098_s2, 256, %s896_s29, [#allocation6], %s799_s9, %s799_s9, %s800_s10  }
  0x40   : > { %s32_s19 = sadd.s32 1, %s789_s16  ;;  %s39_s25 = sadd.s32 1, %s781_s14 }
  0x41   : > { %p34_p13 = scmp.ge.s32.totalorder %s32_s19, 2  ;;  %p46_p6 = scmp.ne.s32.totalorder %s781_s14, %s777_s13 }
  0x42   : > { %p47_p10 = scmp.eq.s32.totalorder %s793_s17, 0  ;;  %p551_p3 = scmp.lt.s32.totalorder %s793_s17, 2 }
  0x43   : > { %s1123_s19 = smov (%p34_p13, %s32_s19), 0  ;;  %p963_p7 = por %p865_p2, %p46_p6 }
  0x44   : > { %p48_p5 = por %p47_p10, %p46_p6  ;;  %s36_s28 = ssub.s32 %s789_s16, %s1123_s19 }
  0x45   : > { %s1110_s27 = scalar_select %p963_p7, 1, 0 }
  0x46   : > { %s172_s30 = sand.u32 1, %s781_s14   ;;  %p37_p9 = scmp.eq.s32.totalorder %s36_s28, 0 }
  0x47   : > { %s470_s29 = sshll.u32 %s172_s30, 4  ;;  %s491_s4 = sshll.u32 %s789_s16, 8 }
  0x48   : > { %s972_s5 = scalar_select %p37_p9, %s781_s14, %s39_s25  }
  0x49   : > { %s977_s8 = scalar_lea.hbm %s1096_s0, %s491_s4  ;;  %s176_s21 = scalar_lea.vmem [#allocation2], %s470_s29 }
  0x4a   : > { %s183_s26 = sshll.u32 %s176_s21, 4  ;;  %p981_p2 = pnand %p551_p3, %p48_p5  ;;  %s985_s26 = int_to_ptr.vmem [resolvable:$true] %s183_s26 }
  0x4b   : > { %s987_s18 = scalar_lea.sflag [#allocation3], %s172_s30  ;;  %s677_s25 = scalar_lea.hbm %s977_s8, 256 }
  0x4c   : > { %p678_p11 = scmp.ne.s32.totalorder %s977_s8, %s677_s25  ;;  %p679_p12 = pneg %p981_p2 }
  0x4d   : > { %s682_s4 = scalar_lea.hbm %s1096_s0, 512  ;;  %p683_p4 = scmp.lt.u32.totalorder %s977_s8, %s1096_s0 }
  0x4e   : > { %p680_p0 = pnand %p679_p12, %p678_p11  ;;  %p684_p13 = scmp.lt.u32.totalorder %s682_s4, %s677_s25 }
  0x4f   : > { %p686_p10 = scmp.lt.u32.totalorder %s677_s25, %s977_s8 }
  0x50   : > { %p681_p1 = pneg %p680_p0  ;;  %p685_p6 = por %p684_p13, %p683_p4 }
  0x52   : > { %p687_p3 = por %p686_p10, %p685_p6 }
  0x54   : > { %p688_p5 = pnand %p687_p3, %p681_p1 }
  0x56   : > { %691 = shalt.err (!%p688_p5)
}
  0x57   : > { %s692_s30 = scalar_lea.vmem %s985_s26, 256  ;;  %s801_s21 = smov [#allocation2]  }
  0x58   : > { %p693_p9 = scmp.ne.s32.totalorder %s985_s26, %s692_s30  ;;  %s697_s28 = sshll.u32 %s801_s21, 4  ;;  %s698_s28 = int_to_ptr.vmem [resolvable:$false] %s697_s28 }
  0x59   : > { %s699_s29 = scalar_lea.vmem %s698_s28, 512  ;;  %p700_p7 = scmp.lt.s32.totalorder %s985_s26, %s698_s28 }
  0x5a   : > { %p695_p11 = pnand %p693_p9, %p679_p12  ;;  %p701_p4 = scmp.lt.s32.totalorder %s699_s29, %s692_s30 }
  0x5c   : > { %p696_p0 = pneg %p695_p11  ;;  %p702_p13 = por %p701_p4, %p700_p7 }
  0x5e   : > { %p703_p6 = pnand %p702_p13, %p696_p0 }
  0x60   : > { %706 = shalt.err (!%p703_p6)
}
  0x61   : > { %544 = dma.hbm_to_vmem [thread:$0]  (!%p981_p2), %s977_s8, 256, %s985_s26, %s987_s18, %s799_s9, %s799_s9, %s800_s10  }
  0x62   : > { %195 = sbr.rel (%p881_p8) target bundleno = 373 (0x175), region = 32  ;;  %s1021_s25 = sand.u32 (!%p881_p8), 1, %s777_s13  }
  0x63   : > { %s474_s4 = sshll.u32 (!%p881_p8), %s1021_s25, 4  ;;  %s198_s6 = scalar_lea.sflag (!%p881_p8), [#allocation3], %s1021_s25 }
  0x64   : > { %s1027_s11 = scalar_lea.vmem (!%p881_p8), [#allocation2], %s474_s4  ;;  %p1112_p7 = scmp.ne.s32.totalorder (!%p881_p8), %s1106_s22, 0 }
  0x69   : > { %760 = dma.done.wait (%p1112_p7), %s198_s6, 256  }
  0x6a   : > { %762 = vsyncadd (%p1112_p7), %s198_s6, 4294967040  ;;  %p1113_p2 = scmp.ne.s32.totalorder %s1104_s20, 0 }
  0x6c   : > { %764 = dma.done.wait (%p1113_p2), [#allocation6], 1280  }
  0x6d   : > { %766 = vsyncadd (%p1113_p2), [#allocation6], 4294966016  ;;  %v802_v0 = vmov 0.0   ;;  %vm803_vm0 = vmmov 0   ;;  %v613_v1 = vld [vmem:[#allocation5] sm:$0xff]   ;;  %v614_v2 = vld [vmem:[#allocation5 + $0x8] sm:$0xff]  }
  0x6e   : > { %502 = vmatprep.subr.bf16.mxu0 %v802_v0  ;;  %518 = vmatprep.mubr.msk.bf16.mxu0 %vm803_vm0, %v802_v0  ;;  %v615_v3 = vld [vmem:[#allocation5 + $0x10] sm:$0xff]   ;;  %v616_v4 = vld [vmem:[#allocation5 + $0x18] sm:$0xff]   ;;  %v617_v5 = vld [vmem:[#allocation5 + $0x20] sm:$0xff]   ;;  %s231_s20 = scalar_lea.vmem [#allocation8], %s474_s4  ;;  %s492_s24 = sshll.u32 %s785_s15, 8 }
  0x6f   : > { %503 = vmatpush3.bf16.msra.mxu0 %v613_v1  ;;  %v618_v6 = vld [vmem:[#allocation5 + $0x28] sm:$0xff]   ;;  %v619_v7 = vld [vmem:[#allocation5 + $0x30] sm:$0xff]   ;;  %v620_v8 = vld [vmem:[#allocation5 + $0x38] sm:$0xff]   ;;  %s362_s22 = sshll.u32 %s231_s20, 4  ;;  %s1047_s8 = scalar_lea.hbm %s1099_s3, %s492_s24  ;;  %s1042_s22 = int_to_ptr.vmem [resolvable:$true] %s362_s22 }
  0x70   : > { %504 = vmatprep.subr.bf16.mxu0 %v802_v0  ;;  %v235_v9 = vld [vmem:[%s1027_s11] sm:$0xff]  ;;  %v236_v10 = vld [vmem:[%s1027_s11 + $0x8] sm:$0xff]  ;;  %s348_s15 = scalar_lea.sflag [#allocation4], %s1021_s25  ;;  %s707_s26 = scalar_lea.vmem %s1042_s22, 256 }
  0x71   : > { %v237_v11 = vpack.c.bf16 %v236_v10, %v235_v9  ;;  %v254_v12 = vld [vmem:[#allocation7] sm:$0xff]  ;;  %v255_v14 = vld [vmem:[#allocation7 + $0x8] sm:$0xff]  ;;  %p708_p8 = scmp.ne.s32.totalorder %s1042_s22, %s707_s26  ;;  %p1114_p12 = scmp.ne.s32.totalorder %s1110_s27, 0 }
  0x72   : > { %s804_s18 = smov [#allocation8]  }
  0x73   : > { %505 = vmatpush3.bf16.msra.mxu0 %v614_v2  ;;  %p709_p1 = pnand %p708_p8, %p1114_p12  ;;  %s711_s7 = sshll.u32 %s804_s18, 4  ;;  %s712_s7 = int_to_ptr.vmem [resolvable:$false] %s711_s7 }
  0x74   : > { %506 = vmatprep.subr.bf16.mxu0 %v802_v0  ;;  %s713_s30 = scalar_lea.vmem %s712_s7, 512  ;;  %p714_p3 = scmp.lt.s32.totalorder %s1042_s22, %s712_s7 }
  0x75   : > { %p710_p10 = pneg %p709_p1  ;;  %p715_p5 = scmp.lt.s32.totalorder %s713_s30, %s707_s26 }
  0x77   : > { %507 = vmatpush3.bf16.msra.mxu0 %v615_v3  ;;  %p716_p9 = por %p715_p5, %p714_p3 }
  0x78   : > { %508 = vmatprep.subr.bf16.mxu0 %v802_v0 }
  0x79   : > { %p717_p11 = pnand %p716_p9, %p710_p10 }
  0x7b   : > { %509 = vmatpush3.bf16.msra.mxu0 %v616_v4 }
  0x7c   : > { %510 = vmatprep.subr.bf16.mxu0 %v802_v0 }
  0x7f   : > { %511 = vmatpush3.bf16.msra.mxu0 %v617_v5 }
  0x80   : > { %512 = vmatprep.subr.bf16.mxu0 %v802_v0 }
  0x83   : > { %513 = vmatpush3.bf16.msra.mxu0 %v618_v6 }
  0x84   : > { %514 = vmatprep.subr.bf16.mxu0 %v802_v0 }
  0x87   : > { %515 = vmatpush3.bf16.msra.mxu0 %v619_v7 }
  0x88   : > { %516 = vmatprep.subr.bf16.mxu0 %v802_v0 }
  0x8b   : > { %517 = vmatpush3.bf16.msra.mxu0 %v620_v8 }
  0x8e   : > { %519 = vmatmul.mubr.bf16.vlgmr.msra.gmra.mrb[0].mxu0 %v237_v11 }
 0x161   : > { %v338_v13 = vpop.f32.mrb[0].mxu0 }
 0x162   : > { %v339_v15 = vadd.f32 %v338_v13, %v254_v12  ;;  %v520_v16 = vpop.f32.mrb[1].mxu0 }
 0x163   : > { %v341_v17 = vpop.f32.mrb[2].mxu0 }
 0x164   : > { %345 = vst [vmem:[%s231_s20] sm:$0xff] %v339_v15  ;;  %v342_v18 = vadd.f32 %v341_v17, %v255_v14  ;;  %v521_v19 = vpop.f32.mrb[3].mxu0 }
 0x166   : > { %346 = vst [vmem:[%s231_s20 + $0x8] sm:$0xff] %v342_v18 }
 0x167   : > { %720 = shalt.err (!%p717_p11)
}
 0x168   : > { %s721_s21 = scalar_lea.hbm %s1047_s8, 256  ;;  %s725_s4 = scalar_lea.hbm %s1099_s3, 512 }
 0x169   : > { %p722_p0 = scmp.ne.s32.totalorder %s1047_s8, %s721_s21  ;;  %p726_p6 = scmp.lt.u32.totalorder %s1047_s8, %s1099_s3 }
 0x16a   : > { %p727_p7 = scmp.lt.u32.totalorder %s725_s4, %s721_s21  ;;  %p729_p8 = scmp.lt.u32.totalorder %s721_s21, %s1047_s8 }
 0x16b   : > { %p723_p4 = pnand %p722_p0, %p1114_p12 }
 0x16c   : > { %p728_p2 = por %p727_p7, %p726_p6 }
 0x16d   : > { %p724_p13 = pneg %p723_p4 }
 0x16e   : > { %p730_p1 = por %p729_p8, %p728_p2 }
 0x170   : > { %p731_p10 = pnand %p730_p1, %p724_p13 }
 0x172   : > { %734 = shalt.err (!%p731_p10)
}
 0x173   : > { %s805_s20 = smov 128   ;;  %s806_s24 = smov 8  }
 0x174   : > { %532 = dma.vmem_to_hbm [thread:$0]  (%p1114_p12), %s1042_s22, 256, %s1047_s8, %s348_s15, %s805_s20, %s805_s20, %s806_s24  }
 0x175 PF: > { %s377_s9 = sand.u32 1, %s773_s12   ;;  %p1115_p3 = scmp.ne.s32.totalorder %s1107_s23, 0 }
 0x176   : > { %p1116_p5 = scmp.ge.s32.totalorder %s793_s17, 2  ;;  %s378_s10 = scalar_lea.sflag [#allocation4], %s377_s9 }
 0x178   : > { %p546_p9 = pnand %p1116_p5, %p1115_p3 }
 0x17a   : > { %768 = dma.done.wait (!%p546_p9), %s378_s10, 256  }
 0x17b   : > { %770 = vsyncadd (!%p546_p9), %s378_s10, 4294967040  ;;  %s20_s17 = sadd.s32 1, %s793_s17   ;;  %s1117_s12 = smov %s777_s13 }
 0x17c   : > { %p17_p11 = scmp.ge.s32.totalorder %s20_s17, 4   ;;  %s1118_s13 = smov %s781_s14 }
 0x17d   : > { %s1119_s14 = smov %s972_s5  ;;  %s1120_s15 = smov %s789_s16 }
 0x17e   : > { %s1121_s16 = smov %s1123_s19  ;;  %19 = sbr.rel (!%p17_p11) target bundleno = 7 (0x7), region = 85 }
 0x185   :  { %383 = vsyncpa [#allocation3], 1 }
 0x186   :  { %385 = vsyncpa [#allocation3 + $0x1], 1 }
 0x187   :  { %386 = vsyncpa [#allocation6], 1 }
 0x188   :  { %387 = vsyncpa [#allocation4], 1 }
 0x189   :  { %389 = vsyncpa [#allocation4 + $0x1], 1 }

</bundles_post_ra>
